<compile_context>
chip_gen: v5e
topology: v5e:2x2
jax: 0.10.0
libtpu: 0.0.40
codegen_flags: <defaults>
</compile_context>

<pallas_src>
import jax
import jax.numpy as jnp
from jax import lax
from jax.experimental import pallas as pl
from jax.experimental.pallas import tpu as pltpu

_LANE = 128
_SUB = 8
_GROUP = _SUB * _LANE  # 1024 elements per 8-row group


def _make_kernel(block_rows, steps, valid_rows_last):
    """Build the partial-sum kernel for a static tiling.

    Output block (3, 8, 128) holds [pos, tp, fn] per-lane partials and stays
    resident in VMEM across the whole (sequential, "arbitrary") grid.
    """
    groups = block_rows // _SUB
    ragged = valid_rows_last != block_rows

    def kernel(p_ref, l_ref, out_ref):
        s = pl.program_id(0)

        @pl.when(s == 0)
        def _init():
            out_ref[...] = jnp.zeros_like(out_ref)

        p = p_ref[...].astype(jnp.float32)   # (block_rows, 128) probabilities
        l = l_ref[...].astype(jnp.float32)   # labels, assumed in {0, 1}

        def accumulate(p, l):
            m = p > 0.5                              # predicted-positive mask (bool)
            ppos = jnp.where(m, p, 0.0)              # prob mass on predicted positives
            tp = ppos * l                            # true-positive mass
            fn = jnp.where(m, 0.0, 1.0 - p) * l      # false-negative mass

            def fold(x):
                # (block_rows,128) -> (8,128): tile-aligned reshape + leading-axis
                # sum = pure VPU vreg adds (no XLU, no extra stores).
                return x.reshape(groups, _SUB, _LANE).sum(axis=0)

            out_ref[...] += jnp.stack([fold(ppos), fold(tp), fold(fn)])

        if not ragged:
            accumulate(p, l)
        else:
            last = steps - 1

            @pl.when(s != last)
            def _fast():
                accumulate(p, l)

            @pl.when(s == last)
            def _masked():
                rid = lax.broadcasted_iota(jnp.int32, (block_rows, _LANE), 0)
                valid = rid < valid_rows_last
                # Mask probs AND labels: garbage OOB rows must not reach pos/fn.
                accumulate(jnp.where(valid, p, 0.0), jnp.where(valid, l, 0.0))

    return kernel


def _partial_sums_pallas(p2, l2, block_rows, steps, valid_rows_last):
    """p2, l2: (rows, 128). Returns (3,) f32 = [pos, tp, fn]."""
    out = pl.pallas_call(
        _make_kernel(block_rows, steps, valid_rows_last),
        out_shape=jax.ShapeDtypeStruct((3, _SUB, _LANE), jnp.float32),
        grid_spec=pltpu.PrefetchScalarGridSpec(
            num_scalar_prefetch=0,
            grid=(steps,),
            in_specs=[
                pl.BlockSpec((block_rows, _LANE), lambda s: (s, 0)),
                pl.BlockSpec((block_rows, _LANE), lambda s: (s, 0)),
            ],
            out_specs=pl.BlockSpec((3, _SUB, _LANE), lambda s: (0, 0, 0)),
        ),
        compiler_params=pltpu.CompilerParams(
            dimension_semantics=("arbitrary",),
        ),
    )(p2, l2)
    # Tiny cross-lane reduction (3*8*128 elements) done in the JAX epilogue.
    return jnp.sum(out, axis=(1, 2))


def _partial_sums_jax(p, l):
    """Pure-JAX partial sums for the short (<1024-element) tail."""
    p = p.astype(jnp.float32)
    l = l.astype(jnp.float32)
    m = p > 0.5
    ppos = jnp.where(m, p, 0.0)
    return jnp.stack([
        jnp.sum(ppos),
        jnp.sum(ppos * l),
        jnp.sum(jnp.where(m, 0.0, 1.0 - p) * l),
    ])


def neg_f1(probs, lbls, *, max_block_rows=1024):
    """probs, lbls: 1-D arrays of the same length; labels must be in {0, 1}.

    Returns the scalar -F1 (float32), matching the PyTorch NegF1 module.
    """
    probs = jnp.asarray(probs)
    lbls = jnp.asarray(lbls)
    assert probs.ndim == 1 and probs.shape == lbls.shape
    n = probs.shape[0]

    # Keep block rows a multiple of 8 (sublane packing for f32 & narrower dtypes).
    max_block_rows = max(_SUB, (max_block_rows // _SUB) * _SUB)

    # Largest prefix whose length is a multiple of 8*128: slice+reshape is a free
    # bitcast (no jnp.pad copy) and `rows` is a multiple of 8.
    rows = (n // _GROUP) * _SUB
    n_main = rows * _LANE

    sums = jnp.zeros((3,), jnp.float32)
    if rows > 0:
        block_rows = min(max_block_rows, rows)
        steps = pl.cdiv(rows, block_rows)
        valid_rows_last = rows - (steps - 1) * block_rows
        p2 = probs[:n_main].reshape(rows, _LANE)
        l2 = lbls[:n_main].reshape(rows, _LANE)
        sums = sums + _partial_sums_pallas(p2, l2, block_rows, steps, valid_rows_last)
    if n_main < n:
        # Tail of < 1024 elements: negligible, handled in plain JAX (no padding).
        sums = sums + _partial_sums_jax(probs[n_main:], lbls[n_main:])

    pos, tp, fn = sums[0], sums[1], sums[2]
    fp = pos - tp
    eps = jnp.float32(1e-5)
    precision = (tp + eps) / (tp + fp + eps)
    recall = (tp + eps) / (tp + fn + eps)
    return -(2.0 * precision * recall) / (precision + recall)
    # TODO(synk): on v7x, split the grid across the 2 TensorCores
    # (pltpu.CORE_PARALLEL / pl.core_map) for up to 2x on this memory-bound scan.


def _neg_f1_ref(probs, lbls):
    """Pure-JAX reference mirroring the PyTorch loop semantics."""
    p = probs.astype(jnp.float32)
    l = lbls.astype(jnp.float32)
    pred_pos = p > 0.5
    tp = jnp.sum(jnp.where(pred_pos & (l == 1.0), p, 0.0))
    fp = jnp.sum(jnp.where(pred_pos & (l == 0.0), p, 0.0))
    fn = jnp.sum(jnp.where(~pred_pos & (l == 1.0), 1.0 - p, 0.0))
    eps = 1e-05
    precision = (tp + eps) / (tp + fp + eps)
    recall = (tp + eps) / (tp + fn + eps)
    return -2.0 * precision * recall / (precision + recall)


if __name__ == "__main__":
    key = jax.random.PRNGKey(0)
    # (N, max_block_rows): exercises the main kernel path, the ragged-last-block
    # masked path, and the tiny pure-JAX fallback for N < 1024.
    cases = [(2311, 1024), (3077, 16), (8, 1024)]
    for n, mbr in cases:
        k1, k2 = jax.random.split(jax.random.fold_in(key, n))
        probs = jax.random.uniform(k1, (n,), dtype=jnp.float32)
        lbls = jax.random.bernoulli(k2, 0.5, (n,)).astype(jnp.float32)
        out = jax.block_until_ready(neg_f1(probs, lbls, max_block_rows=mbr))
        ref = _neg_f1_ref(probs, lbls)
        assert jnp.allclose(out, ref, atol=1e-5, rtol=1e-5), (n, out, ref)
    print("KERNEL_OK")
</pallas_src>

<mosaic_0001>
module attributes {stable_mosaic.version = 11 : i64} {
  func.func @kernel(%arg0: i32, %arg1: memref<16x128xf32, #tpu.memory_space<vmem>>, %arg2: memref<16x128xf32, #tpu.memory_space<vmem>>, %arg3: memref<3x8x128xf32, #tpu.memory_space<vmem>>) attributes {dimension_semantics = [#tpu.dimension_semantics<arbitrary>], iteration_bounds = array<i64: 1>, scalar_prefetch = 0 : i64, scratch_operands = 0 : i64, tpu.core_type = #tpu.core_type<tc>, window_params = [{transform_indices = @transform_0, window_bounds = array<i64: 16, 128>}, {transform_indices = @transform_1, window_bounds = array<i64: 16, 128>}, {pipeline_mode = #tpu.pipeline_mode<synchronous>, transform_indices = @transform_2, window_bounds = array<i64: 3, 8, 128>}]} {
    %c0_i32 = arith.constant 0 : i32
    %0 = arith.cmpi eq, %arg0, %c0_i32 : i32
    %1 = arith.extui %0 : i1 to i32
    %c0_i32_0 = arith.constant 0 : i32
    %2 = arith.cmpi ne, %1, %c0_i32_0 : i32
    scf.if %2 {
      %cst_16 = arith.constant 0.000000e+00 : f32
      %28 = vector.broadcast %cst_16 : f32 to vector<3x8x128xf32>
      %c0_17 = arith.constant 0 : index
      %c0_18 = arith.constant 0 : index
      %c0_19 = arith.constant 0 : index
      %29 = vector.load %arg3[%c0_17, %c0_18, %c0_19] : memref<3x8x128xf32, #tpu.memory_space<vmem>>, vector<3x8x128xf32>
      tpu.vector_store %arg3[%c0_17, %c0_18, %c0_19], %28 {strides = array<i32>} : memref<3x8x128xf32, #tpu.memory_space<vmem>>, vector<3x8x128xf32>,
    } else {
    }
    %c0 = arith.constant 0 : index
    %c0_1 = arith.constant 0 : index
    %3 = vector.load %arg1[%c0, %c0_1] : memref<16x128xf32, #tpu.memory_space<vmem>>, vector<16x128xf32>
    %c0_2 = arith.constant 0 : index
    %c0_3 = arith.constant 0 : index
    %4 = vector.load %arg2[%c0_2, %c0_3] : memref<16x128xf32, #tpu.memory_space<vmem>>, vector<16x128xf32>
    %cst = arith.constant 5.000000e-01 : f32
    %5 = vector.broadcast %cst : f32 to vector<16x128xf32>
    %6 = arith.cmpf ogt, %3, %5 : vector<16x128xf32>
    %cst_4 = arith.constant 0.000000e+00 : f32
    %7 = vector.broadcast %cst_4 : f32 to vector<16x128xf32>
    %8 = arith.select %6, %3, %7 : vector<16x128xi1>, vector<16x128xf32>
    %9 = arith.mulf %8, %4 : vector<16x128xf32>
    %cst_5 = arith.constant 1.000000e+00 : f32
    %10 = vector.broadcast %cst_5 : f32 to vector<16x128xf32>
    %11 = arith.subf %10, %3 : vector<16x128xf32>
    %cst_6 = arith.constant 0.000000e+00 : f32
    %12 = vector.broadcast %cst_6 : f32 to vector<16x128xf32>
    %13 = arith.select %6, %12, %11 : vector<16x128xi1>, vector<16x128xf32>
    %14 = arith.mulf %13, %4 : vector<16x128xf32>
    %c0_7 = arith.constant 0 : index
    %c0_8 = arith.constant 0 : index
    %c0_9 = arith.constant 0 : index
    %15 = vector.load %arg3[%c0_7, %c0_8, %c0_9] : memref<3x8x128xf32, #tpu.memory_space<vmem>>, vector<3x8x128xf32>
    %16 = vector.shape_cast %8 : vector<16x128xf32> to vector<2x8x128xf32>
    %cst_10 = arith.constant dense<0.000000e+00> : vector<8x128xf32>
    %17 = vector.multi_reduction <add>, %16, %cst_10 [0] : vector<2x8x128xf32> to vector<8x128xf32>
    %18 = vector.shape_cast %9 : vector<16x128xf32> to vector<2x8x128xf32>
    %cst_11 = arith.constant dense<0.000000e+00> : vector<8x128xf32>
    %19 = vector.multi_reduction <add>, %18, %cst_11 [0] : vector<2x8x128xf32> to vector<8x128xf32>
    %20 = vector.shape_cast %14 : vector<16x128xf32> to vector<2x8x128xf32>
    %cst_12 = arith.constant dense<0.000000e+00> : vector<8x128xf32>
    %21 = vector.multi_reduction <add>, %20, %cst_12 [0] : vector<2x8x128xf32> to vector<8x128xf32>
    %22 = vector.shape_cast %17 : vector<8x128xf32> to vector<1x8x128xf32>
    %23 = vector.shape_cast %19 : vector<8x128xf32> to vector<1x8x128xf32>
    %24 = vector.shape_cast %21 : vector<8x128xf32> to vector<1x8x128xf32>
    %25 = tpu.concatenate %22, %23, %24 in 0 : vector<1x8x128xf32>, vector<1x8x128xf32>, vector<1x8x128xf32> -> vector<3x8x128xf32>
    %26 = arith.addf %15, %25 : vector<3x8x128xf32>
    %c0_13 = arith.constant 0 : index
    %c0_14 = arith.constant 0 : index
    %c0_15 = arith.constant 0 : index
    %27 = vector.load %arg3[%c0_13, %c0_14, %c0_15] : memref<3x8x128xf32, #tpu.memory_space<vmem>>, vector<3x8x128xf32>
    tpu.vector_store %arg3[%c0_13, %c0_14, %c0_15], %26 {strides = array<i32>} : memref<3x8x128xf32, #tpu.memory_space<vmem>>, vector<3x8x128xf32>,
    return
  }
  func.func @transform_0(%arg0: i32) -> (i32, i32) {
    %c0_i32 = arith.constant 0 : i32
    %c0_i32_0 = arith.constant 0 : i32
    return %arg0, %c0_i32 : i32, i32
  }
  func.func @transform_1(%arg0: i32) -> (i32, i32) {
    %c0_i32 = arith.constant 0 : i32
    %c0_i32_0 = arith.constant 0 : i32
    return %arg0, %c0_i32 : i32, i32
  }
  func.func @transform_2(%arg0: i32) -> (i32, i32, i32) {
    %c0_i32 = arith.constant 0 : i32
    %c0_i32_0 = arith.constant 0 : i32
    %c0_i32_1 = arith.constant 0 : i32
    %c0_i32_2 = arith.constant 0 : i32
    return %c0_i32, %c0_i32_0, %c0_i32_1 : i32, i32, i32
  }
}

</mosaic_0001>

<bundles_post_ra>
// kernel: tpu_custom_call.1
= control target key start
LH: loop header
LB: loop body
LE: loop exit
PB: predicated region body
PF: predicated region fallthrough
CT: control target
= control target key end

     0   :  { %7 = vsyncpa [#allocation3], 0  ;;  %s221_s0 = inlined_call_operand.hbm [shape: f32[16,128], index: 0, kind: input, shape index: {}]   ;;  %s222_s1 = inlined_call_operand.hbm [shape: f32[16,128], index: 1, kind: input, shape index: {}]   ;;  %s223_s2 = inlined_call_operand.hbm [shape: f32[3,8,128], index: 2, kind: output, shape index: {}]  }
   0x1   :  { %8 = vsyncpa [#allocation6], 0 }
   0x2   :  { %9 = vsyncpa [#allocation4], 0  ;;  %s14_s11 = sshll.u32 %s221_s0, 4  ;;  %s183_s12 = smov [#allocation2]   ;;  %s15_s11 = int_to_ptr.hbm [resolvable:$true] %s14_s11 }
   0x3   :  { %s16_s13 = sshll.u32 %s183_s12, 4  ;;  %s27_s16 = sshll.u32 %s222_s1, 4  ;;  %s17_s13 = int_to_ptr.vmem [resolvable:$true] %s16_s13  ;;  %s28_s16 = int_to_ptr.hbm [resolvable:$true] %s27_s16 }
   0x4   :  { %s184_s17 = smov 128   ;;  %s185_s18 = smov 8  }
   0x5   :  { %22 = dma.hbm_to_vmem [thread:$0]  %s15_s11, 256, %s17_s13, [#allocation3], %s184_s17, %s184_s17, %s185_s18  }
   0x6   :  { %s186_s19 = smov [#allocation5]  }
   0x7   :  { %s29_s20 = sshll.u32 %s186_s19, 4  ;;  %s30_s20 = int_to_ptr.vmem [resolvable:$true] %s29_s20 }
   0x8   :  { %35 = dma.hbm_to_vmem [thread:$0]  %s28_s16, 256, %s30_s20, [#allocation6], %s184_s17, %s184_s17, %s185_s18  }
   0x9   :  { %177 = dma.done.wait [#allocation3], 256  }
   0xa   :  { %178 = vsyncadd [#allocation3], 4294967040 }
   0xb   :  { %179 = dma.done.wait [#allocation6], 256  }
   0xc   :  { %180 = vsyncadd [#allocation6], 4294967040  ;;  %v51_v0 = vld [vmem:[#allocation2] sm:$0xff]  ;;  %v52_v1 = vld [vmem:[#allocation2 + $0x8] sm:$0xff]  ;;  %s187_s0 = smov [#allocation7]   ;;  %s85_s23 = sshll.u32 %s223_s2, 4  ;;  %s86_s23 = int_to_ptr.hbm [resolvable:$true] %s85_s23 }
   0xd   :  { %v53_v2 = vld [vmem:[#allocation5] sm:$0xff]  ;;  %vm55_vm0 = vcmp.gt.f32.partialorder %v51_v0, 0.5  ;;  %vm56_vm1 = vcmp.gt.f32.partialorder %v52_v1, 0.5  ;;  %v54_v3 = vld [vmem:[#allocation5 + $0x8] sm:$0xff]  ;;  %v61_v4 = vsub.f32 1.0, %v51_v0  ;;  %v62_v5 = vsub.f32 1.0, %v52_v1 }
   0xe   :  { %v57_v6 = vsel %vm55_vm0, %v51_v0, 0.0  ;;  %v58_v7 = vsel %vm56_vm1, %v52_v1, 0.0  ;;  %s83_s1 = sshll.u32 %s187_s0, 4  ;;  %s84_s1 = int_to_ptr.vmem [resolvable:$true] %s83_s1 }
   0xf   :  { %v70_v8 = vadd.f32 %v58_v7, %v57_v6  ;;  %v59_v9 = vmul.f32 %v57_v6, %v53_v2  ;;  %v60_v10 = vmul.f32 %v58_v7, %v54_v3  ;;  %v63_v11 = vsel %vm55_vm0, 0.0, %v61_v4 }
  0x10   :  { %v64_v12 = vsel %vm56_vm1, 0.0, %v62_v5  ;;  %v65_v13 = vmul.f32 %v63_v11, %v53_v2 }
  0x11   :  { %v71_v14 = vadd.f32 %v60_v10, %v59_v9  ;;  %v66_v15 = vmul.f32 %v64_v12, %v54_v3  ;;  %76 = vst [vmem:[#allocation7] sm:$0xff] %v70_v8 }
  0x13   :  { %v72_v16 = vadd.f32 %v66_v15, %v65_v13  ;;  %77 = vst [vmem:[#allocation7 + $0x8] sm:$0xff] %v71_v14 }
  0x15   :  { %78 = vst [vmem:[#allocation7 + $0x10] sm:$0xff] %v72_v16 }
  0x16   :  { %91 = dma.vmem_to_hbm [thread:$0]  %s84_s1, 384, %s86_s23, [#allocation4], %s184_s17, %s184_s17, %s185_s18  }
  0x17   :  { %181 = dma.done.wait [#allocation4], 384  }
  0x18   :  { %182 = vsyncadd [#allocation4], 4294966912 }
  0x19   :  { %96 = vsyncpa [#allocation3], 1 }
  0x1a   :  { %97 = vsyncpa [#allocation6], 1 }
  0x1b   :  { %98 = vsyncpa [#allocation4], 1 }

</bundles_post_ra>
